<compile_context>
chip_gen: v6e
topology: v6e:2x2x1
jax: 0.10.0
libtpu: 0.0.40
codegen_flags: <defaults>
</compile_context>

<pallas_src>
import jax
import jax.numpy as jnp
from jax.experimental import pallas as pl
from jax.experimental.pallas import tpu as pltpu


def _round_up(x: int, m: int) -> int:
    return (x + m - 1) // m * m


def trainer_kernel(x_ref, w1_ref, b1_ref, w2_ref, b2_ref, o_ref):
    """Fused: per-row standardization -> Linear -> ReLU -> Linear (one B tile)."""
    x = x_ref[...].astype(jnp.float32)                       # (TB, D)
    d = x.shape[-1]

    # Fused single-pass normalizer: one sweep computes sum and sum-of-squares.
    s = jnp.sum(x, axis=-1, keepdims=True)                   # (TB, 1)
    ss = jnp.sum(x * x, axis=-1, keepdims=True)               # (TB, 1)
    mean = s * (1.0 / d)
    var = (ss - s * mean) / (d - 1)                            # unbiased, like torch.std
    # Note: var==0 rows (e.g. zero padding rows) yield inf/nan, matching torch's
    # divide-by-zero-std behavior; padded rows are sliced off outside the kernel.
    xn = (x - mean) * jax.lax.rsqrt(var)                       # (TB, D), f32

    # MXU matmuls: bf16 operands, f32 accumulation.
    h = jnp.dot(xn.astype(jnp.bfloat16), w1_ref[...],
                preferred_element_type=jnp.float32)            # (TB, HID_pad)
    h = jnp.maximum(h + b1_ref[...], 0.0)
    out = jnp.dot(h.astype(jnp.bfloat16), w2_ref[...],
                  preferred_element_type=jnp.float32)          # (TB, OUT_pad)
    o_ref[...] = out + b2_ref[...]                             # lane-dense store


def trainer_forward(x_nchw, w1, b1, w2, b2):
    # Glue: drop the size-1 channel dim explicitly (robust for B==1) and flatten H*W.
    x = jnp.squeeze(x_nchw, axis=1)                            # (B, H, W)
    B = x.shape[0]
    x = x.reshape(B, -1).astype(jnp.float32)                   # (B, D)
    D = x.shape[1]

    HID = w1.shape[1]
    OUT = w2.shape[1]

    # Lane-dense padding of the hidden and output feature dims.
    LANE = 128
    HID_pad = _round_up(HID, LANE)
    OUT_pad = _round_up(OUT, LANE)

    # Batch tiling: pad B to a sublane multiple; use 128-row blocks for big B.
    TB = 128 if B >= 128 else _round_up(B, 8)
    B_pad = _round_up(B, TB)
    nb = B_pad // TB

    if B_pad != B:
        x = jnp.pad(x, ((0, B_pad - B), (0, 0)))

    # Zero-pad weights/biases; padded hidden columns stay exactly zero through
    # ReLU (b1 pad = 0), so padded w2 rows contribute nothing -> math unchanged.
    w1p = jnp.pad(w1, ((0, 0), (0, HID_pad - HID))).astype(jnp.bfloat16)
    w2p = jnp.pad(w2, ((0, HID_pad - HID), (0, OUT_pad - OUT))).astype(jnp.bfloat16)
    b1p = jnp.pad(b1, (0, HID_pad - HID)).reshape(1, HID_pad).astype(jnp.float32)
    b2p = jnp.pad(b2, (0, OUT_pad - OUT)).reshape(1, OUT_pad).astype(jnp.float32)

    flops = (2 * B_pad * D * HID_pad
             + 2 * B_pad * HID_pad * OUT_pad
             + 6 * B_pad * D)
    bytes_accessed = (B_pad * D * 4
                      + D * HID_pad * 2 + HID_pad * OUT_pad * 2
                      + HID_pad * 4 + OUT_pad * 4
                      + B_pad * OUT_pad * 4)

    out_padded = pl.pallas_call(
        trainer_kernel,
        out_shape=jax.ShapeDtypeStruct((B_pad, OUT_pad), jnp.float32),
        grid=(nb,),
        in_specs=[
            pl.BlockSpec((TB, D), lambda i: (i, 0)),           # x tile (pipelined)
            pl.BlockSpec((D, HID_pad), lambda i: (0, 0)),      # w1 (resident)
            pl.BlockSpec((1, HID_pad), lambda i: (0, 0)),      # b1 (lane-padded)
            pl.BlockSpec((HID_pad, OUT_pad), lambda i: (0, 0)),  # w2 (resident)
            pl.BlockSpec((1, OUT_pad), lambda i: (0, 0)),      # b2 (lane-padded)
        ],
        out_specs=pl.BlockSpec((TB, OUT_pad), lambda i: (i, 0)),
        compiler_params=pltpu.CompilerParams(
            dimension_semantics=("parallel",),                 # megacore on v7x
            vmem_limit_bytes=64 * 1024 * 1024,
        ),
        cost_estimate=pl.CostEstimate(
            flops=flops, transcendentals=0, bytes_accessed=bytes_accessed),
    )(x, w1p, b1p, w2p, b2p)

    # Strip batch and feature padding outside the kernel.
    return out_padded[:B, :OUT]


if __name__ == "__main__":
    # Small, deterministic setup consistent with the forward pass.
    B, C, Hs, Ws = 2, 1, 16, 16          # NCHW input, C must be 1 (squeeze)
    D = Hs * Ws                          # 256 flattened features
    HID, OUT = 32, 10                    # MLP: Linear(256,32) -> ReLU -> Linear(32,10)

    key = jax.random.PRNGKey(0)
    kx, k1, k2, k3, k4 = jax.random.split(key, 5)

    x = jax.random.normal(kx, (B, C, Hs, Ws), dtype=jnp.float32)

    # PyTorch-style default init: U(-1/sqrt(fan_in), 1/sqrt(fan_in))
    lim1 = 1.0 / jnp.sqrt(jnp.float32(D))
    lim2 = 1.0 / jnp.sqrt(jnp.float32(HID))
    w1 = jax.random.uniform(k1, (D, HID), jnp.float32, -lim1, lim1)
    b1 = jax.random.uniform(k2, (HID,), jnp.float32, -lim1, lim1)
    w2 = jax.random.uniform(k3, (HID, OUT), jnp.float32, -lim2, lim2)
    b2 = jax.random.uniform(k4, (OUT,), jnp.float32, -lim2, lim2)

    out = trainer_forward(x, w1, b1, w2, b2)
    jax.block_until_ready(out)

    # Pure-JAX f32 reference (same math as the PyTorch module).
    xr = jnp.squeeze(x, axis=1).reshape(B, -1)
    mean = xr.mean(axis=-1, keepdims=True)
    std = jnp.sqrt(((xr - mean) ** 2).sum(axis=-1, keepdims=True) / (D - 1))
    xn = (xr - mean) / std
    ref = jnp.maximum(xn @ w1 + b1, 0.0) @ w2 + b2

    assert out.shape == (B, OUT)
    # Loose tolerance accounts for bf16 matmul operands (f32 accumulation).
    assert jnp.allclose(out, ref, atol=2e-2, rtol=2e-2), (
        f"max err {jnp.max(jnp.abs(out - ref))}")

    print("KERNEL_OK")
</pallas_src>

<mosaic_0001>
module attributes {stable_mosaic.version = 11 : i64} {
  func.func @trainer_kernel(%arg0: i32, %arg1: memref<8x256xf32, #tpu.memory_space<vmem>>, %arg2: memref<256x128xbf16, #tpu.memory_space<vmem>>, %arg3: memref<1x128xf32, #tpu.memory_space<vmem>>, %arg4: memref<128x128xbf16, #tpu.memory_space<vmem>>, %arg5: memref<1x128xf32, #tpu.memory_space<vmem>>, %arg6: memref<8x128xf32, #tpu.memory_space<vmem>>) attributes {dimension_semantics = [#tpu.dimension_semantics<parallel>], iteration_bounds = array<i64: 1>, scalar_prefetch = 0 : i64, scratch_operands = 0 : i64, tpu.core_type = #tpu.core_type<tc>, window_params = [{transform_indices = @transform_0, window_bounds = array<i64: 8, 256>}, {pipeline_mode = #tpu.pipeline_mode<synchronous>, transform_indices = @transform_1, window_bounds = array<i64: 256, 128>}, {pipeline_mode = #tpu.pipeline_mode<synchronous>, transform_indices = @transform_2, window_bounds = array<i64: 1, 128>}, {pipeline_mode = #tpu.pipeline_mode<synchronous>, transform_indices = @transform_3, window_bounds = array<i64: 128, 128>}, {pipeline_mode = #tpu.pipeline_mode<synchronous>, transform_indices = @transform_4, window_bounds = array<i64: 1, 128>}, {transform_indices = @transform_5, window_bounds = array<i64: 8, 128>}]} {
    %c0 = arith.constant 0 : index
    %c0_0 = arith.constant 0 : index
    %0 = vector.load %arg1[%c0, %c0_0] : memref<8x256xf32, #tpu.memory_space<vmem>>, vector<8x256xf32>
    %cst = arith.constant dense<0.000000e+00> : vector<8xf32>
    %1 = vector.multi_reduction <add>, %0, %cst [1] : vector<8x256xf32> to vector<8xf32>
    %2 = vector.shape_cast %1 : vector<8xf32> to vector<8x1xf32>
    %3 = arith.mulf %0, %0 : vector<8x256xf32>
    %cst_1 = arith.constant dense<0.000000e+00> : vector<8xf32>
    %4 = vector.multi_reduction <add>, %3, %cst_1 [1] : vector<8x256xf32> to vector<8xf32>
    %5 = vector.shape_cast %4 : vector<8xf32> to vector<8x1xf32>
    %cst_2 = arith.constant 3.906250e-03 : f32
    %6 = vector.broadcast %cst_2 : f32 to vector<8x1xf32>
    %7 = arith.mulf %2, %6 : vector<8x1xf32>
    %8 = arith.mulf %2, %7 : vector<8x1xf32>
    %9 = arith.subf %5, %8 : vector<8x1xf32>
    %cst_3 = arith.constant 2.550000e+02 : f32
    %10 = vector.broadcast %cst_3 : f32 to vector<8x1xf32>
    %11 = arith.divf %9, %10 : vector<8x1xf32>
    %12 = vector.broadcast %7 : vector<8x1xf32> to vector<8x256xf32>
    %13 = arith.subf %0, %12 : vector<8x256xf32>
    %14 = math.rsqrt %11 : vector<8x1xf32>
    %15 = vector.broadcast %14 : vector<8x1xf32> to vector<8x256xf32>
    %16 = arith.mulf %13, %15 : vector<8x256xf32>
    %17 = arith.truncf %16 : vector<8x256xf32> to vector<8x256xbf16>
    %c0_4 = arith.constant 0 : index
    %c0_5 = arith.constant 0 : index
    %18 = vector.load %arg2[%c0_4, %c0_5] : memref<256x128xbf16, #tpu.memory_space<vmem>>, vector<256x128xbf16>
    %cst_6 = arith.constant dense<0.000000e+00> : vector<8x128xf32>
    %19 = tpu.matmul %17, %18, %cst_6 {dimension_numbers = #tpu.dot_dimension_numbers<[1], [0], [0], [1], [0, 0, 1, 1], [], []>} : vector<8x256xbf16>, vector<256x128xbf16>, vector<8x128xf32> -> vector<8x128xf32>
    %c0_7 = arith.constant 0 : index
    %c0_8 = arith.constant 0 : index
    %20 = vector.load %arg3[%c0_7, %c0_8] : memref<1x128xf32, #tpu.memory_space<vmem>>, vector<1x128xf32>
    %21 = vector.broadcast %20 : vector<1x128xf32> to vector<8x128xf32>
    %22 = arith.addf %19, %21 : vector<8x128xf32>
    %cst_9 = arith.constant 0.000000e+00 : f32
    %23 = vector.broadcast %cst_9 : f32 to vector<8x128xf32>
    %24 = arith.maximumf %22, %23 : vector<8x128xf32>
    %25 = arith.truncf %24 : vector<8x128xf32> to vector<8x128xbf16>
    %c0_10 = arith.constant 0 : index
    %c0_11 = arith.constant 0 : index
    %26 = vector.load %arg4[%c0_10, %c0_11] : memref<128x128xbf16, #tpu.memory_space<vmem>>, vector<128x128xbf16>
    %cst_12 = arith.constant dense<0.000000e+00> : vector<8x128xf32>
    %27 = tpu.matmul %25, %26, %cst_12 {dimension_numbers = #tpu.dot_dimension_numbers<[1], [0], [0], [1], [0, 0, 1, 1], [], []>} : vector<8x128xbf16>, vector<128x128xbf16>, vector<8x128xf32> -> vector<8x128xf32>
    %c0_13 = arith.constant 0 : index
    %c0_14 = arith.constant 0 : index
    %28 = vector.load %arg5[%c0_13, %c0_14] : memref<1x128xf32, #tpu.memory_space<vmem>>, vector<1x128xf32>
    %29 = vector.broadcast %28 : vector<1x128xf32> to vector<8x128xf32>
    %30 = arith.addf %27, %29 : vector<8x128xf32>
    %c0_15 = arith.constant 0 : index
    %c0_16 = arith.constant 0 : index
    %31 = vector.load %arg6[%c0_15, %c0_16] : memref<8x128xf32, #tpu.memory_space<vmem>>, vector<8x128xf32>
    tpu.vector_store %arg6[%c0_15, %c0_16], %30 {strides = array<i32>} : memref<8x128xf32, #tpu.memory_space<vmem>>, vector<8x128xf32>,
    return
  }
  func.func @transform_0(%arg0: i32) -> (i32, i32) {
    %c0_i32 = arith.constant 0 : i32
    %c0_i32_0 = arith.constant 0 : i32
    return %arg0, %c0_i32 : i32, i32
  }
  func.func @transform_1(%arg0: i32) -> (i32, i32) {
    %c0_i32 = arith.constant 0 : i32
    %c0_i32_0 = arith.constant 0 : i32
    %c0_i32_1 = arith.constant 0 : i32
    return %c0_i32, %c0_i32_0 : i32, i32
  }
  func.func @transform_2(%arg0: i32) -> (i32, i32) {
    %c0_i32 = arith.constant 0 : i32
    %c0_i32_0 = arith.constant 0 : i32
    %c0_i32_1 = arith.constant 0 : i32
    return %c0_i32, %c0_i32_0 : i32, i32
  }
  func.func @transform_3(%arg0: i32) -> (i32, i32) {
    %c0_i32 = arith.constant 0 : i32
    %c0_i32_0 = arith.constant 0 : i32
    %c0_i32_1 = arith.constant 0 : i32
    return %c0_i32, %c0_i32_0 : i32, i32
  }
  func.func @transform_4(%arg0: i32) -> (i32, i32) {
    %c0_i32 = arith.constant 0 : i32
    %c0_i32_0 = arith.constant 0 : i32
    %c0_i32_1 = arith.constant 0 : i32
    return %c0_i32, %c0_i32_0 : i32, i32
  }
  func.func @transform_5(%arg0: i32) -> (i32, i32) {
    %c0_i32 = arith.constant 0 : i32
    %c0_i32_0 = arith.constant 0 : i32
    return %arg0, %c0_i32 : i32, i32
  }
}

</mosaic_0001>

<bundles_post_ra>
// kernel: tpu_custom_call.1
= control target key start
LH: loop header
LB: loop body
LE: loop exit
PB: predicated region body
PF: predicated region fallthrough
CT: control target
= control target key end

     0   :  { %10 = vsyncpa [#allocation3], 0  ;;  %s653_s0 = inlined_call_operand.hbm [shape: f32[8,256], index: 0, kind: input, shape index: {}]   ;;  %s654_s1 = inlined_call_operand.hbm [shape: bf16[256,128], index: 1, kind: input, shape index: {}]   ;;  %s655_s2 = inlined_call_operand.vmem [shape: f32[1,128], index: 2, kind: input, shape index: {}]   ;;  %s656_s3 = inlined_call_operand.hbm [shape: bf16[128,128], index: 3, kind: input, shape index: {}]   ;;  %s657_s4 = inlined_call_operand.vmem [shape: f32[1,128], index: 4, kind: input, shape index: {}]   ;;  %s658_s5 = inlined_call_operand.hbm [shape: f32[8,128], index: 5, kind: output, shape index: {}]  }
   0x1   :  { %11 = vsyncpa [#allocation6], 0 }
   0x2   :  { %12 = vsyncpa [#allocation4], 0  ;;  %s585_s18 = smov [#allocation5]  }
   0x3   :  { %s28_s19 = sshll.u32 %s585_s18, 4  ;;  %s29_s19 = int_to_ptr.vmem [resolvable:$true] %s28_s19 }
   0x4   :  { %s507_s20 = scalar_lea.vmem %s29_s19, 2048  ;;  %p512_p1 = scmp.lt.s32.totalorder %s29_s19, %s29_s19 }
   0x5   :  { %p508_p0 = scmp.ne.s32.totalorder %s29_s19, %s507_s20  ;;  %p513_p2 = scmp.lt.s32.totalorder %s507_s20, %s507_s20 }
   0x7   :  { %p514_p3 = por %p513_p2, %p512_p1 }
   0x9   :  { %p515_p4 = pnand %p514_p3, %p508_p0 }
   0xb   :  { %518 = shalt.err (!%p515_p4)
}
   0xc   :  { %s586_s21 = smov 64   ;;  %s587_s22 = smov 4  }
   0xd   :  { %34 = dma.hbm_to_vmem [thread:$0]  %s654_s1, 2048, %s29_s19, [#allocation6], %s586_s21, %s586_s21, %s587_s22  }
   0xe   :  { %s588_s25 = smov [#allocation2]   ;;  %s589_s27 = smov [#allocation7]  }
   0xf   :  { %s19_s26 = sshll.u32 %s588_s25, 4  ;;  %s42_s28 = sshll.u32 %s589_s27, 4  ;;  %s20_s26 = int_to_ptr.vmem [resolvable:$true] %s19_s26  ;;  %s43_s28 = int_to_ptr.vmem [resolvable:$true] %s42_s28 }
  0x10   :  { %s527_s29 = scalar_lea.vmem %s20_s26, 256  ;;  %p532_p6 = scmp.lt.s32.totalorder %s20_s26, %s20_s26 }
  0x11   :  { %p528_p5 = scmp.ne.s32.totalorder %s20_s26, %s527_s29  ;;  %p533_p7 = scmp.lt.s32.totalorder %s527_s29, %s527_s29 }
  0x13   :  { %p534_p8 = por %p533_p7, %p532_p6 }
  0x15   :  { %p535_p9 = pnand %p534_p8, %p528_p5 }
  0x17   :  { %538 = shalt.err (!%p535_p9)
}
  0x18   :  { %22 = dma.hbm_to_vmem [thread:$0]  %s653_s0, 256, %s20_s26, [#allocation3]  }
  0x19   :  { %s547_s7 = scalar_lea.vmem %s43_s28, 1024  ;;  %p552_p11 = scmp.lt.s32.totalorder %s43_s28, %s43_s28 }
  0x1a   :  { %p548_p10 = scmp.ne.s32.totalorder %s43_s28, %s547_s7  ;;  %p553_p12 = scmp.lt.s32.totalorder %s547_s7, %s547_s7 }
  0x1c   :  { %p554_p13 = por %p553_p12, %p552_p11 }
  0x1e   :  { %p555_p0 = pnand %p554_p13, %p548_p10 }
  0x20   :  { %558 = shalt.err (!%p555_p0)
}
  0x21   :  { %48 = dma.hbm_to_vmem [thread:$0]  %s656_s3, 1024, %s43_s28, [#allocation6], %s586_s21, %s586_s21, %s587_s22  }
  0x22   :  { %579 = dma.done.wait [#allocation3], 256  }
  0x23   :  { %580 = vsyncadd [#allocation3], 4294967040 }
  0x24   :  { %581 = dma.done.wait [#allocation6], 3072  }
  0x25   :  { %582 = vsyncadd [#allocation6], 4294964224  ;;  %v632_v0 = vld [vmem:[#allocation2] sm:$0xff]  ;;  %v634_v1 = vld [vmem:[#allocation2 + $0x8] sm:$0xff]  ;;  %v590_v23 = vmov 0.0   ;;  %vm591_vm0 = vmmov 0  }
  0x26   :  { %v63_v2 = vadd.f32 %v634_v1, %v632_v0  ;;  %v66_v3 = vmul.f32 %v632_v0, %v632_v0  ;;  %v67_v4 = vmul.f32 %v634_v1, %v634_v1  ;;  %v473_v5 = vld [vmem:[#allocation5 + $0x78] sm:$0xff]   ;;  %v475_v8 = vld [vmem:[#allocation5 + $0x70] sm:$0xff]   ;;  %v477_v10 = vld [vmem:[#allocation5 + $0x68] sm:$0xff]   ;;  %445 = vmatprep.subr.bf16.mxu1 %v590_v23  ;;  %461 = vmatprep.mubr.msk.bf16.mxu1 %vm591_vm0, %v590_v23  ;;  %s592_s11 = smov [#allocation8]  }
  0x27   :  { %v474_v6 = vld [vmem:[#allocation5 + $0x38] sm:$0xff]   ;;  %414 = vmatprep.subr.bf16.mxu0 %v473_v5  ;;  %v476_v9 = vld [vmem:[#allocation5 + $0x30] sm:$0xff]   ;;  %v478_v11 = vld [vmem:[#allocation5 + $0x28] sm:$0xff]   ;;  %s378_s12 = sshll.u32 %s592_s11, 4  ;;  %s379_s12 = int_to_ptr.vmem [resolvable:$true] %s378_s12 }
  0x28   :  { %64 = vadd.xlane.f32.xlu0 %v63_v2  ;;  %v68_v7 = vadd.f32 %v67_v4, %v66_v3  ;;  %415 = vmatpush3.bf16.msra.mxu0 %v474_v6  ;;  %v479_v12 = vld [vmem:[#allocation5 + $0x60] sm:$0xff]   ;;  %v481_v14 = vld [vmem:[#allocation5 + $0x58] sm:$0xff]   ;;  %v483_v16 = vld [vmem:[#allocation5 + $0x50] sm:$0xff]   ;;  %p564_p2 = scmp.lt.s32.totalorder %s379_s12, %s379_s12 }
  0x29   :  { %416 = vmatprep.subr.bf16.mxu0 %v475_v8  ;;  %v480_v13 = vld [vmem:[#allocation5 + $0x20] sm:$0xff]   ;;  %v482_v15 = vld [vmem:[#allocation5 + $0x18] sm:$0xff]   ;;  %v484_v17 = vld [vmem:[#allocation5 + $0x10] sm:$0xff]  }
  0x2a   :  { %v485_v18 = vld [vmem:[#allocation5 + $0x48] sm:$0xff]   ;;  %v487_v20 = vld [vmem:[#allocation5 + $0x40] sm:$0xff]   ;;  %v489_v22 = vld [vmem:[#allocation7 + $0x38] sm:$0xff]  }
  0x2b   :  { %v486_v19 = vld [vmem:[#allocation5 + $0x8] sm:$0xff]   ;;  %v488_v21 = vld [vmem:[#allocation5] sm:$0xff]   ;;  %446 = vmatpush3.bf16.msra.mxu1 %v489_v22  ;;  %v490_v24 = vld [vmem:[#allocation7 + $0x30] sm:$0xff]  }
  0x2c   :  { %69 = vadd.xlane.f32.xlu0 %v68_v7  ;;  %417 = vmatpush3.bf16.msra.mxu0 %v476_v9  ;;  %v491_v25 = vld [vmem:[#allocation7 + $0x28] sm:$0xff]   ;;  %v492_v26 = vld [vmem:[#allocation7 + $0x20] sm:$0xff]   ;;  %v493_v27 = vld [vmem:[#allocation7 + $0x18] sm:$0xff]  }
  0x2d   :  { %418 = vmatprep.subr.bf16.mxu0 %v477_v10  ;;  %447 = vmatprep.subr.bf16.mxu1 %v590_v23  ;;  %v494_v41 = vld [vmem:[#allocation7 + $0x10] sm:$0xff]   ;;  %v495_v42 = vld [vmem:[#allocation7 + $0x8] sm:$0xff]   ;;  %v496_v43 = vld [vmem:[#allocation7] sm:$0xff]  }
  0x2e   :  { %v388_v45 = vld [vmem:[%s655_s2] ss:$0 sm:$0xff]  ;;  %s559_s2 = scalar_lea.vmem %s379_s12, 128 }
  0x2f   :  { %448 = vmatpush3.bf16.msra.mxu1 %v490_v24  ;;  %v405_v53 = vld [vmem:[%s657_s4] ss:$0 sm:$0xff]  ;;  %p560_p1 = scmp.ne.s32.totalorder %s379_s12, %s559_s2  ;;  %p565_p3 = scmp.lt.s32.totalorder %s559_s2, %s559_s2 }
  0x30   :  { %419 = vmatpush3.bf16.msra.mxu0 %v478_v11  ;;  %449 = vmatprep.subr.bf16.mxu1 %v590_v23 }
  0x31   :  { %420 = vmatprep.subr.bf16.mxu0 %v479_v12  ;;  %p566_p4 = por %p565_p3, %p564_p2 }
  0x33   :  { %450 = vmatpush3.bf16.msra.mxu1 %v491_v25  ;;  %p567_p5 = pnand %p566_p4, %p560_p1 }
  0x34   :  { %421 = vmatpush3.bf16.msra.mxu0 %v480_v13  ;;  %451 = vmatprep.subr.bf16.mxu1 %v590_v23 }
  0x35   :  { %422 = vmatprep.subr.bf16.mxu0 %v481_v14 }
  0x37   :  { %452 = vmatpush3.bf16.msra.mxu1 %v492_v26 }
  0x38   :  { %423 = vmatpush3.bf16.msra.mxu0 %v482_v15  ;;  %453 = vmatprep.subr.bf16.mxu1 %v590_v23 }
  0x39   :  { %424 = vmatprep.subr.bf16.mxu0 %v483_v16 }
  0x3b   :  { %454 = vmatpush3.bf16.msra.mxu1 %v493_v27 }
  0x3c   :  { %425 = vmatpush3.bf16.msra.mxu0 %v484_v17  ;;  %455 = vmatprep.subr.bf16.mxu1 %v590_v23 }
  0x3d   :  { %426 = vmatprep.subr.bf16.mxu0 %v485_v18 }
  0x3f   :  { %456 = vmatpush3.bf16.msra.mxu1 %v494_v41 }
  0x40   :  { %427 = vmatpush3.bf16.msra.mxu0 %v486_v19  ;;  %457 = vmatprep.subr.bf16.mxu1 %v590_v23 }
  0x41   :  { %428 = vmatprep.subr.bf16.mxu0 %v487_v20 }
  0x43   :  { %458 = vmatpush3.bf16.msra.mxu1 %v495_v42 }
  0x44   :  { %429 = vmatpush3.bf16.msra.mxu0 %v488_v21  ;;  %459 = vmatprep.subr.bf16.mxu1 %v590_v23 }
  0x47   :  { %460 = vmatpush3.bf16.msra.mxu1 %v496_v43 }
  0xb1   :  { %v65_v28 = vpop.xlane.xlu0 %64 }
  0xb2   :  { %v71_v29 = vmul.f32 0.00390625, %v65_v28 }
  0xb4   :  { %v72_v30 = vmul.f32 %v71_v29, %v65_v28  ;;  %v76_v34 = vsub.f32 %v632_v0, %v71_v29  ;;  %v77_v35 = vsub.f32 %v634_v1, %v71_v29 }
  0xb5   :  { %v70_v31 = vpop.xlane.xlu0 %69 }
  0xb6   :  { %v73_v32 = vsub.f32 %v70_v31, %v72_v30 }
  0xb8   :  { %v75_v33 = vmul.f32 0.003921569, %v73_v32 }
  0xba   :  { %497 = vrsqrt.f32 %v75_v33 }
  0xc7   :  { %v498_v36 = vpop.eup %497 }
  0xc8   :  { %v80_v37 = vmul.f32 %v498_v36, %v77_v35  ;;  %v79_v38 = vmul.f32 %v498_v36, %v76_v34 }
  0xca   :  { %v82_v39 = vpack.c.bf16 %v80_v37, %v80_v37  ;;  %v81_v40 = vpack.c.bf16 %v79_v38, %v79_v38 }
  0xcc   :  { %250 = vmatprep.mubr.bf16.mxu0 %v82_v39 }
  0xcd   :  { %251 = vmatmul.mubr.bf16.vlgmr.msra.gmra.mxu0 %v81_v40 }
 0x18d   :  { %v430_v44 = vpop.f32.mrf.mxu0 }
 0x18f   :  { %v431_v46 = vpop.f32.mrf.mxu0 }
 0x190   :  { %v432_v47 = vadd.f32 %v431_v46, %v430_v44 }
 0x191   :  { %v433_v48 = vpop.f32.mrf.mxu0 }
 0x192   :  { %v253_v49 = vadd.f32 %v432_v47, %v388_v45 }
 0x193   :  { %v434_v50 = vpop.f32.mrf.mxu0 }
 0x194   :  { %v258_v51 = vmax.f32 %v253_v49, 0.0 }
 0x196   :  { %v259_v52 = vpack.c.bf16 %v258_v51, %v258_v51 }
 0x198   :  { %462 = vmatmul.mubr.bf16.vlgmr.msra.gmra.mxu1 %v259_v52 }
 0x258   :  { %v365_v54 = vpop.f32.mrf.mxu1 }
 0x259   :  { %v366_v55 = vadd.f32 %v405_v53, %v365_v54 }
 0x25a   :  { %v463_v56 = vpop.f32.mrf.mxu1 }
 0x25b   :  { %371 = vst [vmem:[#allocation8] sm:$0xff] %v366_v55 }
 0x25c   :  { %v368_v57 = vpop.f32.mrf.mxu1 }
 0x25d   :  { %570 = shalt.err (!%p567_p5)
}
 0x25e   :  { %381 = dma.vmem_to_hbm [thread:$0]  %s379_s12, 128, %s658_s5, [#allocation4]   ;;  %v464_v58 = vpop.f32.mrf.mxu1 }
 0x25f   :  { %583 = dma.done.wait [#allocation4], 128  }
 0x260   :  { %584 = vsyncadd [#allocation4], 4294967168 }
 0x261   :  { %385 = vsyncpa [#allocation3], 1 }
 0x262   :  { %386 = vsyncpa [#allocation6], 1 }
 0x263   :  { %387 = vsyncpa [#allocation4], 1 }

</bundles_post_ra>
